<compile_context>
chip_gen: v7x
topology: tpu7x:2x2x1
jax: 0.10.0
libtpu: 0.0.40
codegen_flags: <defaults>
</compile_context>

<pallas_src>
import functools

import jax
import jax.numpy as jnp
from jax.experimental import pallas as pl
from jax.experimental.pallas import tpu as pltpu

LANE = 128  # TPU lane width: last-dim tiles should be multiples of this


def _round_up(n, m):
    return ((n + m - 1) // m) * m


def _choose_batch_tile(B):
    # Small batches: one grid step (no per-step pipeline overhead).
    # Large batches: big tiles so each step is many vregs tall.
    if B <= 512:
        return B
    for t in (512, 256, 128, 64, 32, 16, 8):
        if B % t == 0:
            return t
    return B


def mlp_kernel(x_ref, w1_ref, b1_ref, g_ref, beta_ref, w2_ref, b2_ref, o_ref,
               *, hidden_dims):
    """out = SiLU(LayerNorm(x @ W1 + b1)) @ W2 + b2 for one batch tile.

    Hidden / output feature axes may be zero-padded to a lane multiple (128);
    `hidden_dims` is the real (unpadded) LayerNorm width.
    """
    x = x_ref[...]

    # Linear 1 (MXU, f32 accumulate). Padded hidden columns of W1/b1 are zero,
    # so padded columns of h are exactly zero.
    h = jnp.dot(x, w1_ref[...], preferred_element_type=jnp.float32) + b1_ref[...]

    # LayerNorm over the real hidden width (eps = 1e-5, torch default).
    hp = h.shape[-1]
    inv_h = 1.0 / float(hidden_dims)
    mean = jnp.sum(h, axis=-1, keepdims=True) * inv_h   # padded cols contribute 0
    centered = h - mean
    if hp != hidden_dims:
        col = jax.lax.broadcasted_iota(jnp.int32, h.shape, dimension=1)
        centered = jnp.where(col < hidden_dims, centered, 0.0)
    var = jnp.sum(centered * centered, axis=-1, keepdims=True) * inv_h
    hn = centered * jax.lax.rsqrt(var + 1e-5)
    hn = hn * g_ref[...] + beta_ref[...]   # padded cols: gamma=0, beta=0 -> 0

    # SiLU: x * sigmoid(x) (sigmoid lowers to the EUP).
    act = hn * jax.nn.sigmoid(hn)

    # Linear 2 (MXU). Padded output columns stay zero (zero W2 cols / zero b2),
    # and the store is lane-dense because the padded out dim is a 128 multiple.
    out = jnp.dot(act.astype(w2_ref.dtype), w2_ref[...],
                  preferred_element_type=jnp.float32) + b2_ref[...]
    o_ref[...] = out.astype(o_ref.dtype)


@functools.partial(jax.jit, static_argnames=("batch_tile",))
def mlp_forward(x, w1, b1, gamma, beta, w2, b2, *, batch_tile=None):
    B, D_in = x.shape
    H = w1.shape[1]
    D_out = w2.shape[1]

    # Lane-dense feature padding for the hidden and output dims.
    Hp = _round_up(H, LANE)
    Dp_out = _round_up(D_out, LANE)

    if batch_tile is None:
        batch_tile = _choose_batch_tile(B)
    if B % batch_tile != 0:
        batch_tile = B  # fall back: whole batch in one grid step
    num_tiles = B // batch_tile

    # Pad params once in the wrapper (zeros keep the math exact).
    w1p = jnp.pad(w1, ((0, 0), (0, Hp - H)))
    b1p = jnp.pad(b1, (0, Hp - H)).reshape(1, Hp)
    gp = jnp.pad(gamma, (0, Hp - H)).reshape(1, Hp)
    betap = jnp.pad(beta, (0, Hp - H)).reshape(1, Hp)
    w2p = jnp.pad(w2, ((0, Hp - H), (0, Dp_out - D_out)))
    b2p = jnp.pad(b2, (0, Dp_out - D_out)).reshape(1, Dp_out)

    # ---- VMEM budget guard (portable down to v7x's 64 MiB per-TC VMEM). ----
    item = jnp.dtype(x.dtype).itemsize
    w_item = jnp.dtype(w1.dtype).itemsize
    n_x_buf = 3 if num_tiles >= 4 else 2
    resident = (D_in * Hp + Hp * Dp_out + 3 * Hp + Dp_out) * w_item
    streamed = (n_x_buf * batch_tile * D_in + 2 * batch_tile * Dp_out) * item
    intermediates = 4 * batch_tile * Hp * 4  # f32 temporaries
    est_vmem = resident + streamed + intermediates
    if est_vmem > (48 << 20):
        # TODO(synk): add a hidden-dim ("arbitrary") reduction grid axis with an
        # f32 accumulator scratch so W1/W2 need not stay fully VMEM-resident.
        raise ValueError(
            f"layer too large for resident-weight kernel (~{est_vmem >> 20} MiB VMEM)")
    vmem_limit = int(min(max(2 * est_vmem, 8 << 20), 64 << 20))

    x_spec_kwargs = {}
    if num_tiles >= 4:
        # Deeper input pipelining once the x DMA is actually streamed per step.
        x_spec_kwargs["pipeline_mode"] = pl.Buffered(3)

    out_padded = pl.pallas_call(
        functools.partial(mlp_kernel, hidden_dims=H),
        out_shape=jax.ShapeDtypeStruct((B, Dp_out), x.dtype),
        grid_spec=pltpu.PrefetchScalarGridSpec(
            num_scalar_prefetch=0,
            grid=(num_tiles,),
            in_specs=[
                pl.BlockSpec((batch_tile, D_in), lambda i: (i, 0), **x_spec_kwargs),
                pl.BlockSpec((D_in, Hp), lambda i: (0, 0)),     # W1 (resident)
                pl.BlockSpec((1, Hp), lambda i: (0, 0)),        # b1
                pl.BlockSpec((1, Hp), lambda i: (0, 0)),        # gamma
                pl.BlockSpec((1, Hp), lambda i: (0, 0)),        # beta
                pl.BlockSpec((Hp, Dp_out), lambda i: (0, 0)),   # W2 (resident)
                pl.BlockSpec((1, Dp_out), lambda i: (0, 0)),    # b2
            ],
            out_specs=pl.BlockSpec((batch_tile, Dp_out), lambda i: (i, 0)),
        ),
        compiler_params=pltpu.CompilerParams(
            dimension_semantics=("parallel",),
            vmem_limit_bytes=vmem_limit,
        ),
    )(x, w1p, b1p, gp, betap, w2p, b2p)

    # Strip output padding back to the real feature width.
    return out_padded[:, :D_out]


def init_params(key, input_dims, output_dims, hidden_dims=32):
    """Deterministic init matching the shapes of the PyTorch MLP
    (num_layers=2 -> one hidden Linear+LayerNorm+SiLU, then output Linear)."""
    k1, k2, k3, k4 = jax.random.split(key, 4)
    lim1 = 1.0 / jnp.sqrt(input_dims)
    lim2 = 1.0 / jnp.sqrt(hidden_dims)
    w1 = jax.random.uniform(k1, (input_dims, hidden_dims), jnp.float32, -lim1, lim1)
    b1 = jax.random.uniform(k2, (hidden_dims,), jnp.float32, -lim1, lim1)
    gamma = jnp.ones((hidden_dims,), jnp.float32)   # LayerNorm weight
    beta = jnp.zeros((hidden_dims,), jnp.float32)   # LayerNorm bias
    w2 = jax.random.uniform(k3, (hidden_dims, output_dims), jnp.float32, -lim2, lim2)
    b2 = jax.random.uniform(k4, (output_dims,), jnp.float32, -lim2, lim2)
    return w1, b1, gamma, beta, w2, b2


def mlp_reference(x, w1, b1, gamma, beta, w2, b2):
    """Pure-JAX reference for correctness check."""
    h = x @ w1 + b1
    mean = jnp.mean(h, axis=-1, keepdims=True)
    var = jnp.mean((h - mean) ** 2, axis=-1, keepdims=True)
    hn = (h - mean) / jnp.sqrt(var + 1e-5)
    hn = hn * gamma + beta
    act = hn * jax.nn.sigmoid(hn)
    return act @ w2 + b2


if __name__ == "__main__":
    key = jax.random.PRNGKey(0)
    k_x, k_p = jax.random.split(key)

    batch, input_dims, hidden_dims, output_dims = 16, 16, 32, 8
    x = jax.random.normal(k_x, (batch, input_dims), jnp.float32)
    params = init_params(k_p, input_dims, output_dims, hidden_dims)

    out = mlp_forward(x, *params)
    out = jax.block_until_ready(out)

    ref = mlp_reference(x, *params)
    assert out.shape == (batch, output_dims)
    assert jnp.allclose(out, ref, atol=1e-4, rtol=1e-4), "mismatch vs reference"

    print("KERNEL_OK")
</pallas_src>

<mosaic_0001>
module attributes {stable_mosaic.version = 11 : i64} {
  func.func @mlp_kernel(%arg0: i32, %arg1: memref<16x16xf32, #tpu.memory_space<vmem>>, %arg2: memref<16x128xf32, #tpu.memory_space<vmem>>, %arg3: memref<1x128xf32, #tpu.memory_space<vmem>>, %arg4: memref<1x128xf32, #tpu.memory_space<vmem>>, %arg5: memref<1x128xf32, #tpu.memory_space<vmem>>, %arg6: memref<128x128xf32, #tpu.memory_space<vmem>>, %arg7: memref<1x128xf32, #tpu.memory_space<vmem>>, %arg8: memref<16x128xf32, #tpu.memory_space<vmem>>) attributes {dimension_semantics = [#tpu.dimension_semantics<parallel>], iteration_bounds = array<i64: 1>, scalar_prefetch = 0 : i64, scratch_operands = 0 : i64, tpu.core_type = #tpu.core_type<tc>, window_params = [{transform_indices = @transform_0, window_bounds = array<i64: 16, 16>}, {pipeline_mode = #tpu.pipeline_mode<synchronous>, transform_indices = @transform_1, window_bounds = array<i64: 16, 128>}, {pipeline_mode = #tpu.pipeline_mode<synchronous>, transform_indices = @transform_2, window_bounds = array<i64: 1, 128>}, {pipeline_mode = #tpu.pipeline_mode<synchronous>, transform_indices = @transform_3, window_bounds = array<i64: 1, 128>}, {pipeline_mode = #tpu.pipeline_mode<synchronous>, transform_indices = @transform_4, window_bounds = array<i64: 1, 128>}, {pipeline_mode = #tpu.pipeline_mode<synchronous>, transform_indices = @transform_5, window_bounds = array<i64: 128, 128>}, {pipeline_mode = #tpu.pipeline_mode<synchronous>, transform_indices = @transform_6, window_bounds = array<i64: 1, 128>}, {transform_indices = @transform_7, window_bounds = array<i64: 16, 128>}]} {
    %c0 = arith.constant 0 : index
    %c0_0 = arith.constant 0 : index
    %0 = vector.load %arg1[%c0, %c0_0] : memref<16x16xf32, #tpu.memory_space<vmem>>, vector<16x16xf32>
    %c0_1 = arith.constant 0 : index
    %c0_2 = arith.constant 0 : index
    %1 = vector.load %arg2[%c0_1, %c0_2] : memref<16x128xf32, #tpu.memory_space<vmem>>, vector<16x128xf32>
    %cst = arith.constant dense<0.000000e+00> : vector<16x128xf32>
    %2 = tpu.matmul %0, %1, %cst {dimension_numbers = #tpu.dot_dimension_numbers<[1], [0], [0], [1], [0, 0, 1, 1], [], []>} : vector<16x16xf32>, vector<16x128xf32>, vector<16x128xf32> -> vector<16x128xf32>
    %c0_3 = arith.constant 0 : index
    %c0_4 = arith.constant 0 : index
    %3 = vector.load %arg3[%c0_3, %c0_4] : memref<1x128xf32, #tpu.memory_space<vmem>>, vector<1x128xf32>
    %4 = vector.broadcast %3 : vector<1x128xf32> to vector<16x128xf32>
    %5 = arith.addf %2, %4 : vector<16x128xf32>
    %cst_5 = arith.constant dense<0.000000e+00> : vector<16xf32>
    %6 = vector.multi_reduction <add>, %5, %cst_5 [1] : vector<16x128xf32> to vector<16xf32>
    %7 = vector.shape_cast %6 : vector<16xf32> to vector<16x1xf32>
    %cst_6 = arith.constant 3.125000e-02 : f32
    %8 = vector.broadcast %cst_6 : f32 to vector<16x1xf32>
    %9 = arith.mulf %7, %8 : vector<16x1xf32>
    %10 = vector.broadcast %9 : vector<16x1xf32> to vector<16x128xf32>
    %11 = arith.subf %5, %10 : vector<16x128xf32>
    %12 = tpu.iota {dimensions = array<i32: 1>} : vector<16x128xi32>
    %c32_i32 = arith.constant 32 : i32
    %13 = vector.broadcast %c32_i32 : i32 to vector<16x128xi32>
    %14 = arith.cmpi slt, %12, %13 : vector<16x128xi32>
    %cst_7 = arith.constant 0.000000e+00 : f32
    %15 = vector.broadcast %cst_7 : f32 to vector<16x128xf32>
    %16 = arith.select %14, %11, %15 : vector<16x128xi1>, vector<16x128xf32>
    %17 = arith.mulf %16, %16 : vector<16x128xf32>
    %cst_8 = arith.constant dense<0.000000e+00> : vector<16xf32>
    %18 = vector.multi_reduction <add>, %17, %cst_8 [1] : vector<16x128xf32> to vector<16xf32>
    %19 = vector.shape_cast %18 : vector<16xf32> to vector<16x1xf32>
    %cst_9 = arith.constant 3.125000e-02 : f32
    %20 = vector.broadcast %cst_9 : f32 to vector<16x1xf32>
    %21 = arith.mulf %19, %20 : vector<16x1xf32>
    %cst_10 = arith.constant 9.99999974E-6 : f32
    %22 = vector.broadcast %cst_10 : f32 to vector<16x1xf32>
    %23 = arith.addf %21, %22 : vector<16x1xf32>
    %24 = math.rsqrt %23 : vector<16x1xf32>
    %25 = vector.broadcast %24 : vector<16x1xf32> to vector<16x128xf32>
    %26 = arith.mulf %16, %25 : vector<16x128xf32>
    %c0_11 = arith.constant 0 : index
    %c0_12 = arith.constant 0 : index
    %27 = vector.load %arg4[%c0_11, %c0_12] : memref<1x128xf32, #tpu.memory_space<vmem>>, vector<1x128xf32>
    %28 = vector.broadcast %27 : vector<1x128xf32> to vector<16x128xf32>
    %29 = arith.mulf %26, %28 : vector<16x128xf32>
    %c0_13 = arith.constant 0 : index
    %c0_14 = arith.constant 0 : index
    %30 = vector.load %arg5[%c0_13, %c0_14] : memref<1x128xf32, #tpu.memory_space<vmem>>, vector<1x128xf32>
    %31 = vector.broadcast %30 : vector<1x128xf32> to vector<16x128xf32>
    %32 = arith.addf %29, %31 : vector<16x128xf32>
    %33 = arith.negf %32 : vector<16x128xf32>
    %34 = math.exp %33 : vector<16x128xf32>
    %cst_15 = arith.constant 1.000000e+00 : f32
    %35 = vector.broadcast %cst_15 : f32 to vector<16x128xf32>
    %36 = arith.addf %35, %34 : vector<16x128xf32>
    %37 = arith.divf %35, %36 : vector<16x128xf32>
    %38 = arith.mulf %32, %37 : vector<16x128xf32>
    %c0_16 = arith.constant 0 : index
    %c0_17 = arith.constant 0 : index
    %39 = vector.load %arg6[%c0_16, %c0_17] : memref<128x128xf32, #tpu.memory_space<vmem>>, vector<128x128xf32>
    %cst_18 = arith.constant dense<0.000000e+00> : vector<16x128xf32>
    %40 = tpu.matmul %38, %39, %cst_18 {dimension_numbers = #tpu.dot_dimension_numbers<[1], [0], [0], [1], [0, 0, 1, 1], [], []>} : vector<16x128xf32>, vector<128x128xf32>, vector<16x128xf32> -> vector<16x128xf32>
    %c0_19 = arith.constant 0 : index
    %c0_20 = arith.constant 0 : index
    %41 = vector.load %arg7[%c0_19, %c0_20] : memref<1x128xf32, #tpu.memory_space<vmem>>, vector<1x128xf32>
    %42 = vector.broadcast %41 : vector<1x128xf32> to vector<16x128xf32>
    %43 = arith.addf %40, %42 : vector<16x128xf32>
    %c0_21 = arith.constant 0 : index
    %c0_22 = arith.constant 0 : index
    %44 = vector.load %arg8[%c0_21, %c0_22] : memref<16x128xf32, #tpu.memory_space<vmem>>, vector<16x128xf32>
    tpu.vector_store %arg8[%c0_21, %c0_22], %43 {strides = array<i32>} : memref<16x128xf32, #tpu.memory_space<vmem>>, vector<16x128xf32>,
    return
  }
  func.func @transform_0(%arg0: i32) -> (i32, i32) {
    %c0_i32 = arith.constant 0 : i32
    %c0_i32_0 = arith.constant 0 : i32
    return %arg0, %c0_i32 : i32, i32
  }
  func.func @transform_1(%arg0: i32) -> (i32, i32) {
    %c0_i32 = arith.constant 0 : i32
    %c0_i32_0 = arith.constant 0 : i32
    %c0_i32_1 = arith.constant 0 : i32
    return %c0_i32, %c0_i32_0 : i32, i32
  }
  func.func @transform_2(%arg0: i32) -> (i32, i32) {
    %c0_i32 = arith.constant 0 : i32
    %c0_i32_0 = arith.constant 0 : i32
    %c0_i32_1 = arith.constant 0 : i32
    return %c0_i32, %c0_i32_0 : i32, i32
  }
  func.func @transform_3(%arg0: i32) -> (i32, i32) {
    %c0_i32 = arith.constant 0 : i32
    %c0_i32_0 = arith.constant 0 : i32
    %c0_i32_1 = arith.constant 0 : i32
    return %c0_i32, %c0_i32_0 : i32, i32
  }
  func.func @transform_4(%arg0: i32) -> (i32, i32) {
    %c0_i32 = arith.constant 0 : i32
    %c0_i32_0 = arith.constant 0 : i32
    %c0_i32_1 = arith.constant 0 : i32
    return %c0_i32, %c0_i32_0 : i32, i32
  }
  func.func @transform_5(%arg0: i32) -> (i32, i32) {
    %c0_i32 = arith.constant 0 : i32
    %c0_i32_0 = arith.constant 0 : i32
    %c0_i32_1 = arith.constant 0 : i32
    return %c0_i32, %c0_i32_0 : i32, i32
  }
  func.func @transform_6(%arg0: i32) -> (i32, i32) {
    %c0_i32 = arith.constant 0 : i32
    %c0_i32_0 = arith.constant 0 : i32
    %c0_i32_1 = arith.constant 0 : i32
    return %c0_i32, %c0_i32_0 : i32, i32
  }
  func.func @transform_7(%arg0: i32) -> (i32, i32) {
    %c0_i32 = arith.constant 0 : i32
    %c0_i32_0 = arith.constant 0 : i32
    return %arg0, %c0_i32 : i32, i32
  }
}

</mosaic_0001>

<bundles_post_ra>
// kernel: mlp_forward.1
= control target key start
LH: loop header
LB: loop body
LE: loop exit
PB: predicated region body
PF: predicated region fallthrough
CT: control target
= control target key end

     0   :  { %vm37_vm0 = vcmask 130048   ;;  %v127_v10 = vlaneseq  ;;  %s520_s1 = inlined_call_operand.vmem [shape: f32[16,128], index: 1, kind: input, shape index: {}]   ;;  %s521_s0 = inlined_call_operand.vmem [shape: f32[16,16], index: 0, kind: input, shape index: {}]   ;;  %s522_s2 = inlined_call_operand.vmem [shape: f32[1,128], index: 2, kind: input, shape index: {}]   ;;  %s523_s5 = inlined_call_operand.vmem [shape: f32[128,128], index: 5, kind: input, shape index: {}]   ;;  %s524_s3 = inlined_call_operand.vmem [shape: f32[1,128], index: 3, kind: input, shape index: {}]   ;;  %s525_s4 = inlined_call_operand.vmem [shape: f32[1,128], index: 4, kind: input, shape index: {}]   ;;  %s526_s6 = inlined_call_operand.vmem [shape: f32[1,128], index: 6, kind: input, shape index: {}]   ;;  %s527_s7 = inlined_call_operand.vmem [shape: f32[16,128], index: 7, kind: output, shape index: {}]  }
   0x1   :  { %v28_v0 = vld [vmem:[%s520_s1] sm:$0xff]  ;;  %v29_v1 = vld [vmem:[%s520_s1 + $0x8] sm:$0xff]  ;;  %v180_v24 = vld [vmem:[%s523_s5 + $0x10] sm:$0xff] }
   0x2   :  { %v26_v2 = vld [vmem:[%s521_s0] sm:$0xff]  ;;  %v354_v3 = vpack.c.bf16 %v29_v1, %v28_v0  ;;  %v27_v4 = vld [vmem:[%s521_s0 + $0x8] sm:$0xff]  ;;  %v128_v11 = vand.u32 127, %v127_v10  ;;  %v181_v26 = vld [vmem:[%s523_s5 + $0x18] sm:$0xff] }
   0x3   :  { %316 = vmatprep.mubr.msk.f32.mxu0 %vm37_vm0, %v26_v2  ;;  %v282_v5 = vld [vmem:[%s522_s2] ss:$0 sm:$0xff]  ;;  %v179_v23 = vld [vmem:[%s523_s5 + $0x8] sm:$0xff]  ;;  %v362_v27 = vpack.c.bf16 %v181_v26, %v180_v24  ;;  %v184_v31 = vld [vmem:[%s523_s5 + $0x30] sm:$0xff] }
   0x4   :  { %355 = vmatprep.subr.bf16.mxu0 %v354_v3  ;;  %vm129_vm1 = vcmp.lt.s32.totalorder %v128_v11, 32  ;;  %v178_v22 = vld [vmem:[%s523_s5] sm:$0xff]  ;;  %v183_v29 = vld [vmem:[%s523_s5 + $0x28] sm:$0xff]  ;;  %v185_v32 = vld [vmem:[%s523_s5 + $0x38] sm:$0xff] }
   0x5   :  { %357 = vmatpush3.bf16.msra.mxu0 %v354_v3  ;;  %v358_v25 = vpack.c.bf16 %v179_v23, %v178_v22  ;;  %v182_v28 = vld [vmem:[%s523_s5 + $0x20] sm:$0xff]  ;;  %v370_v33 = vpack.c.bf16 %v185_v32, %v184_v31  ;;  %v187_v35 = vld [vmem:[%s523_s5 + $0x48] sm:$0xff]  ;;  %v188_v37 = vld [vmem:[%s523_s5 + $0x50] sm:$0xff] }
   0x6   :  { %v366_v30 = vpack.c.bf16 %v183_v29, %v182_v28  ;;  %v186_v34 = vld [vmem:[%s523_s5 + $0x40] sm:$0xff]  ;;  %v189_v38 = vld [vmem:[%s523_s5 + $0x58] sm:$0xff]  ;;  %v191_v41 = vld [vmem:[%s523_s5 + $0x68] sm:$0xff] }
   0x7   :  { %359 = vmatprep.subr.bf16.mxu1 %v358_v25  ;;  %v374_v36 = vpack.c.bf16 %v187_v35, %v186_v34  ;;  %v378_v39 = vpack.c.bf16 %v189_v38, %v188_v37  ;;  %v190_v40 = vld [vmem:[%s523_s5 + $0x60] sm:$0xff]  ;;  %v192_v43 = vld [vmem:[%s523_s5 + $0x70] sm:$0xff]  ;;  %v193_v44 = vld [vmem:[%s523_s5 + $0x78] sm:$0xff] }
   0x8   :  { %317 = vmatmul.mubr.msk.f32.vlgmr.msra.gmra.mrb[0].mxu0 %vm37_vm0, %v27_v4  ;;  %361 = vmatpush3.bf16.msra.mxu1 %v358_v25  ;;  %v382_v42 = vpack.c.bf16 %v191_v41, %v190_v40  ;;  %v386_v45 = vpack.c.bf16 %v193_v44, %v192_v43  ;;  %v285_v53 = vld [vmem:[%s524_s3] ss:$0 sm:$0xff] }
   0x9   :  { %363 = vmatprep.subr.bf16.mxu1 %v362_v27  ;;  %v286_v55 = vld [vmem:[%s525_s4] ss:$0 sm:$0xff] }
   0xc   :  { %365 = vmatpush3.bf16.msra.mxu1 %v362_v27 }
   0xd   :  { %367 = vmatprep.subr.bf16.mxu1 %v366_v30 }
  0x10   :  { %369 = vmatpush3.bf16.msra.mxu1 %v366_v30 }
  0x11   :  { %371 = vmatprep.subr.bf16.mxu1 %v370_v33 }
  0x14   :  { %373 = vmatpush3.bf16.msra.mxu1 %v370_v33 }
  0x15   :  { %375 = vmatprep.subr.bf16.mxu1 %v374_v36 }
  0x18   :  { %377 = vmatpush3.bf16.msra.mxu1 %v374_v36 }
  0x19   :  { %379 = vmatprep.subr.bf16.mxu1 %v378_v39 }
  0x1c   :  { %381 = vmatpush3.bf16.msra.mxu1 %v378_v39 }
  0x1d   :  { %383 = vmatprep.subr.bf16.mxu1 %v382_v42 }
  0x20   :  { %385 = vmatpush3.bf16.msra.mxu1 %v382_v42 }
  0x21   :  { %387 = vmatprep.subr.bf16.mxu1 %v386_v45 }
  0x24   :  { %389 = vmatpush3.bf16.msra.mxu1 %v386_v45 }
  0xdb   :  { %v318_v6 = vpop.f32.mrb[0].mxu0 }
  0xdc   :  { %v110_v7 = vpop.f32.mrb[1].mxu0  ;;  %v116_v9 = vadd.f32 %v318_v6, %v282_v5 }
  0xdd   :  { %v111_v8 = vadd.f32 %v282_v5, %v110_v7 }
  0xdf   :  { %119 = vadd.xlane.f32.xlu0 %v111_v8 }
  0xe3   :  { %121 = vadd.xlane.f32.xlu0 %v116_v9 }
 0x16c   :  { %v120_v12 = vpop.xlane.xlu0 %119 }
 0x16d   :  { %v123_v13 = vmul.f32 0.03125, %v120_v12 }
 0x16f   :  { %v125_v14 = vsub.f32 %v111_v8, %v123_v13  ;;  %v289_v8 = vld [vmem:[%s526_s6] ss:$0 sm:$0xff] }
 0x170   :  { %v122_v15 = vpop.xlane.xlu0 %121 }
 0x171   :  { %v124_v16 = vmul.f32 0.03125, %v122_v15  ;;  %v130_v17 = vsel %vm129_vm1, %v125_v14, 0.0 }
 0x172   :  { %v132_v18 = vmul.f32 %v130_v17, %v130_v17 }
 0x173   :  { %v126_v19 = vsub.f32 %v116_v9, %v124_v16 }
 0x174   :  { %134 = vadd.xlane.f32.xlu1 %v132_v18 }
 0x175   :  { %v131_v20 = vsel %vm129_vm1, %v126_v19, 0.0 }
 0x176   :  { %v133_v21 = vmul.f32 %v131_v20, %v131_v20 }
 0x178   :  { %136 = vadd.xlane.f32.xlu1 %v133_v21 }
 0x201   :  { %v135_v46 = vpop.xlane.xlu1 %134 }
 0x202   :  { %v138_v47 = vmul.f32 0.03125, %v135_v46 }
 0x204   :  { %v140_v48 = vadd.f32 1e-05, %v138_v47 }
 0x205   :  { %v137_v49 = vpop.xlane.xlu1 %136 }
 0x206   :  { %390 = vrsqrt.f32 %v140_v48  ;;  %v139_v50 = vmul.f32 0.03125, %v137_v49 }
 0x208   :  { %v141_v51 = vadd.f32 1e-05, %v139_v50 }
 0x20a   :  { %392 = vrsqrt.f32 %v141_v51 }
 0x210   :  { %v391_v52 = vpop.eup %390 }
 0x211   :  { %v144_v54 = vmul.f32 %v391_v52, %v130_v17 }
 0x213   :  { %v153_v56 = vmul.f32 %v285_v53, %v144_v54 }
 0x214   :  { %v393_v57 = vpop.eup %392 }
 0x215   :  { %v145_v58 = vmul.f32 %v393_v57, %v131_v20  ;;  %v162_v59 = vadd.f32 %v286_v55, %v153_v56 }
 0x217   :  { %v154_v60 = vmul.f32 %v285_v53, %v145_v58  ;;  %v287_v61 = vmul.f32 -1.442695, %v162_v59 }
 0x219   :  { %v163_v62 = vadd.f32 %v286_v55, %v154_v60  ;;  %394 = vpow2.f32 %v287_v61 }
 0x21b   :  { %v288_v63 = vmul.f32 -1.442695, %v163_v62 }
 0x21d   :  { %396 = vpow2.f32 %v288_v63 }
 0x223   :  { %v395_v0 = vpop.eup %394 }
 0x224   :  { %v170_v1 = vadd.f32 1.0, %v395_v0 }
 0x226   :  { %398 = vrcp.f32 %v170_v1 }
 0x227   :  { %v397_v2 = vpop.eup %396 }
 0x228   :  { %v171_v3 = vadd.f32 1.0, %v397_v2 }
 0x22a   :  { %400 = vrcp.f32 %v171_v3 }
 0x230   :  { %v399_v4 = vpop.eup %398 }
 0x231   :  { %v176_v5 = vmul.f32 %v399_v4, %v162_v59 }
 0x233   :  { %351 = vmatprep.mubr.f32.mxu1 %v176_v5 }
 0x234   :  { %v401_v6 = vpop.eup %400 }
 0x235   :  { %v177_v7 = vmul.f32 %v401_v6, %v163_v62 }
 0x237   :  { %352 = vmatmul.mubr.f32.vlgmr.msra.gmra.mrb[0].mxu1 %v177_v7 }
 0x30a   :  { %v353_v9 = vpop.f32.mrb[0].mxu1 }
 0x30b   :  { %v273_v10 = vadd.f32 %v353_v9, %v289_v8  ;;  %v267_v11 = vpop.f32.mrb[1].mxu1 }
 0x30c   :  { %v268_v12 = vadd.f32 %v289_v8, %v267_v11 }
 0x30d   :  { %277 = vst [vmem:[%s527_s7 + $0x8] sm:$0xff] %v273_v10 }
 0x30e   :  { %276 = vst [vmem:[%s527_s7] sm:$0xff] %v268_v12 }

</bundles_post_ra>
